<compile_context>
chip_gen: v5e
topology: v5e:2x2
jax: 0.10.0
libtpu: 0.0.40
codegen_flags: <defaults>
</compile_context>

<pallas_src>
import functools

import jax
import jax.numpy as jnp
from jax.experimental import pallas as pl
from jax.experimental.pallas import tpu as pltpu


def _round_up(n, m):
    return ((n + m - 1) // m) * m


def _vmem_capacity_bytes():
    """Best-effort physical VMEM capacity query (falls back to 64 MiB)."""
    default = 64 * 1024 * 1024
    try:
        info = pltpu.get_tpu_info()
    except Exception:
        return default
    for attr in ("vmem_capacity_bytes", "vmem_bytes"):
        cap = getattr(info, attr, None)
        if cap:
            return int(cap)
    return default


def peg_kernel(x_ref, w_ref, b_ref, ml_ref, mr_ref, o_ref, pad_ref, *,
               img_w, stage_off):
    """Depthwise 3x3 conv + bias + residual + cls passthrough for one
    (batch, channel-tile) block.

    x_ref : (L, Ct)    full token sequence (row 0 = cls token, L = 1 + h*w)
    w_ref : (3, 3, Ct) per-channel 3x3 filters (channels-last)
    b_ref : (1, Ct)    per-channel bias
    ml_ref: (L, 1)     f32 0/1 mask: output row has a left in-row neighbour
    mr_ref: (L, 1)     f32 0/1 mask: output row has a right in-row neighbour
    o_ref : (L, Ct)    output (same token layout as x)
    pad_ref: (pad_rows, Ct) f32 VMEM scratch holding the zero-halo'd tokens.

    Scratch layout: rows [stage_off, stage_off + L) hold the staged input
    block (row `stage_off` = cls, zeroed after staging so it acts as halo);
    rows [0, stage_off) and [stage_off + L, stage_off + L + img_w] are zero.
    Tap (dy, dx) for output row i is then pad[stage_off + dy*img_w + dx + i].
    """
    L, ct = x_ref.shape
    pad_rows = pad_ref.shape[0]
    f32 = jnp.float32

    xb = x_ref[...]                       # (L, Ct), input dtype, aligned load
    xf = xb.astype(f32)                   # cast once
    # TODO(synk): for bf16 activations on v6e/v7x, stage in bf16 and upcast per
    # tap to halve scratch bytes; kept f32 here (also required on v5e).

    # --- build the zero-halo'd token image in VMEM (bulk stores aligned) -----
    # Top halo (stage_off rows, 8-aligned start, covers the dy = -1 reads).
    pad_ref[pl.ds(0, stage_off), :] = jnp.zeros((stage_off, ct), f32)
    # Bottom halo: zero an aligned region covering [stage_off+L, stage_off+L+w];
    # the few token rows it overlaps are rewritten by the staging store below.
    zb_start = ((stage_off + L) // 8) * 8
    pad_ref[pl.ds(zb_start, pad_rows - zb_start), :] = jnp.zeros(
        (pad_rows - zb_start, ct), f32)
    # Stage the full input block at the aligned offset (row stage_off = cls).
    pad_ref[pl.ds(stage_off, L), :] = xf
    # Kill the cls row so it reads back as zero halo for the first image row.
    pad_ref[pl.ds(stage_off, 1), :] = jnp.zeros((1, ct), f32)

    ml = ml_ref[...]                      # (L, 1) f32
    mr = mr_ref[...]                      # (L, 1) f32

    def tap(shift):                       # (L, Ct) slab shifted by `shift` rows
        return pad_ref[pl.ds(stage_off + shift, L), :]

    def wv(dy, dx):                       # (Ct,) per-channel filter coefficient
        return w_ref[dy + 1, dx + 1, :].astype(f32)

    # out[i] = x[i] + bias + sum_{dy,dx} w[dy,dx] * tok_padded[i-1 + dy*w + dx]
    # dx = 0 column: centre tap folded into the residual (x * (1 + w[1,1])).
    acc = (xf * (1.0 + wv(0, 0))
           + tap(-img_w) * wv(-1, 0)
           + tap(img_w) * wv(1, 0))
    # dx = -1 column: one mask multiply for all three dy taps.
    acc = acc + ml * (tap(-img_w - 1) * wv(-1, -1)
                      + tap(-1) * wv(0, -1)
                      + tap(img_w - 1) * wv(1, -1))
    # dx = +1 column.
    acc = acc + mr * (tap(-img_w + 1) * wv(-1, 1)
                      + tap(1) * wv(0, 1)
                      + tap(img_w + 1) * wv(1, 1))
    acc = acc + b_ref[...].astype(f32)    # bias added once

    # One aligned full-block store, then overwrite the single cls row
    # (row 0 of acc is garbage-but-finite and is simply replaced).
    o_ref[...] = acc.astype(o_ref.dtype)
    o_ref[pl.ds(0, 1), :] = xb[0:1, :]


def peg_forward(x, h, w, weight, bias):
    """PEG forward.

    x:      (B, 1 + h*w, C)
    weight: (3, 3, C)   depthwise conv filters, channels-last
    bias:   (C,)
    returns (B, 1 + h*w, C)

    Note: the kernel aliases its (possibly channel-padded) input buffer to the
    output; when C % 128 == 0 this donates x's buffer.
    """
    batch, length, channel = x.shape
    assert length == 1 + h * w, "sequence length must be 1 + h*w"
    orig_channel = channel

    # Zero-pad channels to a multiple of 128: keeps every output store
    # lane-dense (no masked vst) and every channel tile (8,128)-legal.
    c_padded = _round_up(max(channel, 128), 128)
    if c_padded != channel:
        pad_c = c_padded - channel
        x = jnp.pad(x, ((0, 0), (0, 0), (0, pad_c)))
        weight = jnp.pad(weight, ((0, 0), (0, 0), (0, pad_c)))
        bias = jnp.pad(bias, ((0, pad_c),))
        channel = c_padded

    # Scratch geometry: tokens staged at an 8-aligned offset >= w+1 so the
    # largest negative tap (-(w+1)) stays in bounds and the staging store is
    # sublane-aligned.
    stage_off = _round_up(w + 1, 8)
    pad_rows = _round_up(stage_off + length + w + 1, 8)

    # Per-generation VMEM budget: v7x has 64 MiB/TC -> stay well under it so
    # double-buffering still fits; v5e/v6e have 128 MiB -> allow wide tiles.
    vmem_cap = _vmem_capacity_bytes()
    budget = (96 << 20) if vmem_cap >= (100 << 20) else (48 << 20)

    itemsize = x.dtype.itemsize

    def vmem_estimate(ct):
        return (4 * length * ct * itemsize        # in + out blocks, 2x buffered
                + pad_rows * ct * 4               # halo scratch (f32)
                + 3 * length * ct * 4             # live f32 temporaries
                + 32 * ct * 4)                    # filters / bias / masks

    # Largest lane-dense channel tile that fits the budget.
    c_tile = 128
    for cand in (512, 256, 128):
        if channel % cand == 0 and vmem_estimate(cand) <= budget:
            c_tile = cand
            break
    # TODO(synk): for very large token grids (e.g. h=w=56 with C>=512 on v7x)
    # add a token-row grid axis (8-16 image rows + 1-row halo per block)
    # instead of a full-L block per step.
    vmem_limit = int(min(max(vmem_estimate(c_tile) * 5 // 4, 32 << 20), budget))

    # 0/1 column masks in output-row space (row 0 = cls -> both 0); tiny,
    # constant-folded by XLA.
    idx = jnp.arange(length, dtype=jnp.int32)
    col = (idx - 1) % w
    mask_l = ((idx >= 1) & (col > 0)).astype(jnp.float32).reshape(length, 1)
    mask_r = ((idx >= 1) & (col < w - 1)).astype(jnp.float32).reshape(length, 1)

    kern = functools.partial(peg_kernel, img_w=w, stage_off=stage_off)

    grid_spec = pltpu.PrefetchScalarGridSpec(
        num_scalar_prefetch=0,
        grid=(batch, channel // c_tile),
        in_specs=[
            pl.BlockSpec((None, length, c_tile), lambda i, j: (i, 0, j)),
            pl.BlockSpec((3, 3, c_tile), lambda i, j: (0, 0, j)),
            pl.BlockSpec((1, c_tile), lambda i, j: (0, j)),
            pl.BlockSpec((length, 1), lambda i, j: (0, 0)),
            pl.BlockSpec((length, 1), lambda i, j: (0, 0)),
        ],
        out_specs=pl.BlockSpec((None, length, c_tile), lambda i, j: (i, 0, j)),
        scratch_shapes=[pltpu.VMEM((pad_rows, c_tile), jnp.float32)],
    )

    out = pl.pallas_call(
        kern,
        out_shape=jax.ShapeDtypeStruct((batch, length, channel), x.dtype),
        grid_spec=grid_spec,
        input_output_aliases={0: 0},     # reuse x's (padded) buffer for out
        compiler_params=pltpu.CompilerParams(
            dimension_semantics=("parallel", "parallel"),
            vmem_limit_bytes=vmem_limit,
        ),
    )(x, weight, bias.reshape(1, channel), mask_l, mask_r)

    if orig_channel != channel:
        out = out[..., :orig_channel]
    return out


def peg_reference(x, h, w, weight, bias):
    """Pure-JAX reference (depthwise conv via lax.conv_general_dilated)."""
    b, length, channel = x.shape
    cls_token = x[:, :1]
    feat = x[:, 1:].reshape(b, h, w, channel)
    kern = weight.reshape(3, 3, 1, channel)               # HWIO, depthwise
    conv = jax.lax.conv_general_dilated(
        feat, kern, window_strides=(1, 1), padding="SAME",
        dimension_numbers=("NHWC", "HWIO", "NHWC"),
        feature_group_count=channel)
    conv = conv + bias.reshape(1, 1, 1, channel) + feat
    return jnp.concatenate([cls_token, conv.reshape(b, h * w, channel)], axis=1)


if __name__ == "__main__":
    key = jax.random.PRNGKey(0)
    k_x, k_w, k_b = jax.random.split(key, 3)

    B, DIM, H, W = 2, 32, 8, 8
    L = 1 + H * W

    x = jax.random.normal(k_x, (B, L, DIM), dtype=jnp.float32)
    # deterministic init mimicking nn.Conv2d default (uniform, bound = 1/sqrt(fan_in=9))
    bound = 1.0 / 3.0
    weight = jax.random.uniform(k_w, (3, 3, DIM), jnp.float32, -bound, bound)
    bias = jax.random.uniform(k_b, (DIM,), jnp.float32, -bound, bound)

    # compute the reference first (x's buffer may be donated to the kernel)
    ref = peg_reference(x, H, W, weight, bias)

    out = jax.block_until_ready(peg_forward(x, H, W, weight, bias))

    assert out.shape == (B, L, DIM)
    assert jnp.allclose(out, ref, atol=1e-5, rtol=1e-5), "mismatch vs reference"

    print("KERNEL_OK")
</pallas_src>

<mosaic_0001>
module attributes {stable_mosaic.version = 11 : i64} {
  func.func @peg_kernel(%arg0: i32, %arg1: i32, %arg2: memref<1x65x128xf32, #tpu.memory_space<vmem>>, %arg3: memref<3x3x128xf32, #tpu.memory_space<vmem>>, %arg4: memref<1x128xf32, #tpu.memory_space<vmem>>, %arg5: memref<65x1xf32, #tpu.memory_space<vmem>>, %arg6: memref<65x1xf32, #tpu.memory_space<vmem>>, %arg7: memref<1x65x128xf32, #tpu.memory_space<vmem>>, %arg8: memref<96x128xf32, #tpu.memory_space<vmem>>) attributes {dimension_semantics = [#tpu.dimension_semantics<parallel>, #tpu.dimension_semantics<parallel>], iteration_bounds = array<i64: 2, 1>, scalar_prefetch = 0 : i64, scratch_operands = 1 : i64, tpu.core_type = #tpu.core_type<tc>, window_params = [{transform_indices = @transform_0, window_bounds = array<i64: 1, 65, 128>}, {transform_indices = @transform_1, window_bounds = array<i64: 3, 3, 128>}, {transform_indices = @transform_2, window_bounds = array<i64: 1, 128>}, {pipeline_mode = #tpu.pipeline_mode<synchronous>, transform_indices = @transform_3, window_bounds = array<i64: 65, 1>}, {pipeline_mode = #tpu.pipeline_mode<synchronous>, transform_indices = @transform_4, window_bounds = array<i64: 65, 1>}, {transform_indices = @transform_5, window_bounds = array<i64: 1, 65, 128>}]} {
    %c0 = arith.constant 0 : index
    %c0_0 = arith.constant 0 : index
    %c0_1 = arith.constant 0 : index
    %0 = vector.load %arg2[%c0, %c0_0, %c0_1] : memref<1x65x128xf32, #tpu.memory_space<vmem>>, vector<1x65x128xf32>
    %1 = vector.shape_cast %0 : vector<1x65x128xf32> to vector<65x128xf32>
    %cst = arith.constant 0.000000e+00 : f32
    %2 = vector.broadcast %cst : f32 to vector<16x128xf32>
    %c0_2 = arith.constant 0 : index
    %c0_3 = arith.constant 0 : index
    %3 = vector.load %arg8[%c0_2, %c0_3] : memref<96x128xf32, #tpu.memory_space<vmem>>, vector<16x128xf32>
    tpu.vector_store %arg8[%c0_2, %c0_3], %2 {strides = array<i32>} : memref<96x128xf32, #tpu.memory_space<vmem>>, vector<16x128xf32>,
    %cst_4 = arith.constant 0.000000e+00 : f32
    %4 = vector.broadcast %cst_4 : f32 to vector<16x128xf32>
    %c80 = arith.constant 80 : index
    %c0_5 = arith.constant 0 : index
    %5 = vector.load %arg8[%c80, %c0_5] : memref<96x128xf32, #tpu.memory_space<vmem>>, vector<16x128xf32>
    tpu.vector_store %arg8[%c80, %c0_5], %4 {strides = array<i32>} : memref<96x128xf32, #tpu.memory_space<vmem>>, vector<16x128xf32>,
    %c16 = arith.constant 16 : index
    %c0_6 = arith.constant 0 : index
    %6 = vector.load %arg8[%c16, %c0_6] : memref<96x128xf32, #tpu.memory_space<vmem>>, vector<65x128xf32>
    tpu.vector_store %arg8[%c16, %c0_6], %1 {strides = array<i32>} : memref<96x128xf32, #tpu.memory_space<vmem>>, vector<65x128xf32>,
    %cst_7 = arith.constant 0.000000e+00 : f32
    %7 = vector.broadcast %cst_7 : f32 to vector<1x128xf32>
    %c16_8 = arith.constant 16 : index
    %c0_9 = arith.constant 0 : index
    %8 = vector.load %arg8[%c16_8, %c0_9] : memref<96x128xf32, #tpu.memory_space<vmem>>, vector<1x128xf32>
    tpu.vector_store %arg8[%c16_8, %c0_9], %7 {strides = array<i32>} : memref<96x128xf32, #tpu.memory_space<vmem>>, vector<1x128xf32>,
    %c0_10 = arith.constant 0 : index
    %c0_11 = arith.constant 0 : index
    %9 = vector.load %arg5[%c0_10, %c0_11] : memref<65x1xf32, #tpu.memory_space<vmem>>, vector<65x1xf32>
    %c0_12 = arith.constant 0 : index
    %c0_13 = arith.constant 0 : index
    %10 = vector.load %arg6[%c0_12, %c0_13] : memref<65x1xf32, #tpu.memory_space<vmem>>, vector<65x1xf32>
    %c1 = arith.constant 1 : index
    %c1_14 = arith.constant 1 : index
    %c0_15 = arith.constant 0 : index
    %11 = vector.load %arg3[%c1, %c1_14, %c0_15] : memref<3x3x128xf32, #tpu.memory_space<vmem>>, vector<1x1x128xf32>
    %12 = vector.shape_cast %11 : vector<1x1x128xf32> to vector<128xf32>
    %cst_16 = arith.constant 1.000000e+00 : f32
    %13 = vector.broadcast %cst_16 : f32 to vector<128xf32>
    %14 = arith.addf %13, %12 : vector<128xf32>
    %15 = vector.shape_cast %14 : vector<128xf32> to vector<1x128xf32>
    %16 = vector.broadcast %15 : vector<1x128xf32> to vector<65x128xf32>
    %17 = arith.mulf %1, %16 : vector<65x128xf32>
    %c8 = arith.constant 8 : index
    %c0_17 = arith.constant 0 : index
    %18 = vector.load %arg8[%c8, %c0_17] : memref<96x128xf32, #tpu.memory_space<vmem>>, vector<65x128xf32>
    %c0_18 = arith.constant 0 : index
    %c1_19 = arith.constant 1 : index
    %c0_20 = arith.constant 0 : index
    %19 = vector.load %arg3[%c0_18, %c1_19, %c0_20] : memref<3x3x128xf32, #tpu.memory_space<vmem>>, vector<1x1x128xf32>
    %20 = vector.shape_cast %19 : vector<1x1x128xf32> to vector<128xf32>
    %21 = vector.shape_cast %20 : vector<128xf32> to vector<1x128xf32>
    %22 = vector.broadcast %21 : vector<1x128xf32> to vector<65x128xf32>
    %23 = arith.mulf %18, %22 : vector<65x128xf32>
    %24 = arith.addf %17, %23 : vector<65x128xf32>
    %c24 = arith.constant 24 : index
    %c0_21 = arith.constant 0 : index
    %25 = vector.load %arg8[%c24, %c0_21] : memref<96x128xf32, #tpu.memory_space<vmem>>, vector<65x128xf32>
    %c2 = arith.constant 2 : index
    %c1_22 = arith.constant 1 : index
    %c0_23 = arith.constant 0 : index
    %26 = vector.load %arg3[%c2, %c1_22, %c0_23] : memref<3x3x128xf32, #tpu.memory_space<vmem>>, vector<1x1x128xf32>
    %27 = vector.shape_cast %26 : vector<1x1x128xf32> to vector<128xf32>
    %28 = vector.shape_cast %27 : vector<128xf32> to vector<1x128xf32>
    %29 = vector.broadcast %28 : vector<1x128xf32> to vector<65x128xf32>
    %30 = arith.mulf %25, %29 : vector<65x128xf32>
    %31 = arith.addf %24, %30 : vector<65x128xf32>
    %c7 = arith.constant 7 : index
    %c0_24 = arith.constant 0 : index
    %32 = vector.load %arg8[%c7, %c0_24] : memref<96x128xf32, #tpu.memory_space<vmem>>, vector<65x128xf32>
    %c0_25 = arith.constant 0 : index
    %c0_26 = arith.constant 0 : index
    %c0_27 = arith.constant 0 : index
    %33 = vector.load %arg3[%c0_25, %c0_26, %c0_27] : memref<3x3x128xf32, #tpu.memory_space<vmem>>, vector<1x1x128xf32>
    %34 = vector.shape_cast %33 : vector<1x1x128xf32> to vector<128xf32>
    %35 = vector.shape_cast %34 : vector<128xf32> to vector<1x128xf32>
    %36 = vector.broadcast %35 : vector<1x128xf32> to vector<65x128xf32>
    %37 = arith.mulf %32, %36 : vector<65x128xf32>
    %c15 = arith.constant 15 : index
    %c0_28 = arith.constant 0 : index
    %38 = vector.load %arg8[%c15, %c0_28] : memref<96x128xf32, #tpu.memory_space<vmem>>, vector<65x128xf32>
    %c1_29 = arith.constant 1 : index
    %c0_30 = arith.constant 0 : index
    %c0_31 = arith.constant 0 : index
    %39 = vector.load %arg3[%c1_29, %c0_30, %c0_31] : memref<3x3x128xf32, #tpu.memory_space<vmem>>, vector<1x1x128xf32>
    %40 = vector.shape_cast %39 : vector<1x1x128xf32> to vector<128xf32>
    %41 = vector.shape_cast %40 : vector<128xf32> to vector<1x128xf32>
    %42 = vector.broadcast %41 : vector<1x128xf32> to vector<65x128xf32>
    %43 = arith.mulf %38, %42 : vector<65x128xf32>
    %44 = arith.addf %37, %43 : vector<65x128xf32>
    %c23 = arith.constant 23 : index
    %c0_32 = arith.constant 0 : index
    %45 = vector.load %arg8[%c23, %c0_32] : memref<96x128xf32, #tpu.memory_space<vmem>>, vector<65x128xf32>
    %c2_33 = arith.constant 2 : index
    %c0_34 = arith.constant 0 : index
    %c0_35 = arith.constant 0 : index
    %46 = vector.load %arg3[%c2_33, %c0_34, %c0_35] : memref<3x3x128xf32, #tpu.memory_space<vmem>>, vector<1x1x128xf32>
    %47 = vector.shape_cast %46 : vector<1x1x128xf32> to vector<128xf32>
    %48 = vector.shape_cast %47 : vector<128xf32> to vector<1x128xf32>
    %49 = vector.broadcast %48 : vector<1x128xf32> to vector<65x128xf32>
    %50 = arith.mulf %45, %49 : vector<65x128xf32>
    %51 = arith.addf %44, %50 : vector<65x128xf32>
    %52 = vector.broadcast %9 : vector<65x1xf32> to vector<65x128xf32>
    %53 = arith.mulf %52, %51 : vector<65x128xf32>
    %54 = arith.addf %31, %53 : vector<65x128xf32>
    %c9 = arith.constant 9 : index
    %c0_36 = arith.constant 0 : index
    %55 = vector.load %arg8[%c9, %c0_36] : memref<96x128xf32, #tpu.memory_space<vmem>>, vector<65x128xf32>
    %c0_37 = arith.constant 0 : index
    %c2_38 = arith.constant 2 : index
    %c0_39 = arith.constant 0 : index
    %56 = vector.load %arg3[%c0_37, %c2_38, %c0_39] : memref<3x3x128xf32, #tpu.memory_space<vmem>>, vector<1x1x128xf32>
    %57 = vector.shape_cast %56 : vector<1x1x128xf32> to vector<128xf32>
    %58 = vector.shape_cast %57 : vector<128xf32> to vector<1x128xf32>
    %59 = vector.broadcast %58 : vector<1x128xf32> to vector<65x128xf32>
    %60 = arith.mulf %55, %59 : vector<65x128xf32>
    %c17 = arith.constant 17 : index
    %c0_40 = arith.constant 0 : index
    %61 = vector.load %arg8[%c17, %c0_40] : memref<96x128xf32, #tpu.memory_space<vmem>>, vector<65x128xf32>
    %c1_41 = arith.constant 1 : index
    %c2_42 = arith.constant 2 : index
    %c0_43 = arith.constant 0 : index
    %62 = vector.load %arg3[%c1_41, %c2_42, %c0_43] : memref<3x3x128xf32, #tpu.memory_space<vmem>>, vector<1x1x128xf32>
    %63 = vector.shape_cast %62 : vector<1x1x128xf32> to vector<128xf32>
    %64 = vector.shape_cast %63 : vector<128xf32> to vector<1x128xf32>
    %65 = vector.broadcast %64 : vector<1x128xf32> to vector<65x128xf32>
    %66 = arith.mulf %61, %65 : vector<65x128xf32>
    %67 = arith.addf %60, %66 : vector<65x128xf32>
    %c25 = arith.constant 25 : index
    %c0_44 = arith.constant 0 : index
    %68 = vector.load %arg8[%c25, %c0_44] : memref<96x128xf32, #tpu.memory_space<vmem>>, vector<65x128xf32>
    %c2_45 = arith.constant 2 : index
    %c2_46 = arith.constant 2 : index
    %c0_47 = arith.constant 0 : index
    %69 = vector.load %arg3[%c2_45, %c2_46, %c0_47] : memref<3x3x128xf32, #tpu.memory_space<vmem>>, vector<1x1x128xf32>
    %70 = vector.shape_cast %69 : vector<1x1x128xf32> to vector<128xf32>
    %71 = vector.shape_cast %70 : vector<128xf32> to vector<1x128xf32>
    %72 = vector.broadcast %71 : vector<1x128xf32> to vector<65x128xf32>
    %73 = arith.mulf %68, %72 : vector<65x128xf32>
    %74 = arith.addf %67, %73 : vector<65x128xf32>
    %75 = vector.broadcast %10 : vector<65x1xf32> to vector<65x128xf32>
    %76 = arith.mulf %75, %74 : vector<65x128xf32>
    %77 = arith.addf %54, %76 : vector<65x128xf32>
    %c0_48 = arith.constant 0 : index
    %c0_49 = arith.constant 0 : index
    %78 = vector.load %arg4[%c0_48, %c0_49] : memref<1x128xf32, #tpu.memory_space<vmem>>, vector<1x128xf32>
    %79 = vector.broadcast %78 : vector<1x128xf32> to vector<65x128xf32>
    %80 = arith.addf %77, %79 : vector<65x128xf32>
    %c0_50 = arith.constant 0 : index
    %c0_51 = arith.constant 0 : index
    %c0_52 = arith.constant 0 : index
    %81 = vector.load %arg7[%c0_50, %c0_51, %c0_52] : memref<1x65x128xf32, #tpu.memory_space<vmem>>, vector<1x65x128xf32>
    %82 = vector.shape_cast %81 : vector<1x65x128xf32> to vector<65x128xf32>
    %83 = vector.shape_cast %80 : vector<65x128xf32> to vector<1x65x128xf32>
    tpu.vector_store %arg7[%c0_50, %c0_51, %c0_52], %83 {strides = array<i32>} : memref<1x65x128xf32, #tpu.memory_space<vmem>>, vector<1x65x128xf32>,
    %84 = vector.extract_strided_slice %1 {offsets = [0, 0], sizes = [1, 128], strides = [1, 1]} : vector<65x128xf32> to vector<1x128xf32>
    %c0_53 = arith.constant 0 : index
    %c0_54 = arith.constant 0 : index
    %c0_55 = arith.constant 0 : index
    %85 = vector.load %arg7[%c0_53, %c0_54, %c0_55] : memref<1x65x128xf32, #tpu.memory_space<vmem>>, vector<1x1x128xf32>
    %86 = vector.shape_cast %85 : vector<1x1x128xf32> to vector<1x128xf32>
    %87 = vector.shape_cast %84 : vector<1x128xf32> to vector<1x1x128xf32>
    tpu.vector_store %arg7[%c0_53, %c0_54, %c0_55], %87 {strides = array<i32>} : memref<1x65x128xf32, #tpu.memory_space<vmem>>, vector<1x1x128xf32>,
    return
  }
  func.func @transform_0(%arg0: i32, %arg1: i32) -> (i32, i32, i32) {
    %c0_i32 = arith.constant 0 : i32
    %c0_i32_0 = arith.constant 0 : i32
    return %arg0, %c0_i32, %arg1 : i32, i32, i32
  }
  func.func @transform_1(%arg0: i32, %arg1: i32) -> (i32, i32, i32) {
    %c0_i32 = arith.constant 0 : i32
    %c0_i32_0 = arith.constant 0 : i32
    %c0_i32_1 = arith.constant 0 : i32
    return %c0_i32, %c0_i32_0, %arg1 : i32, i32, i32
  }
  func.func @transform_2(%arg0: i32, %arg1: i32) -> (i32, i32) {
    %c0_i32 = arith.constant 0 : i32
    %c0_i32_0 = arith.constant 0 : i32
    return %c0_i32, %arg1 : i32, i32
  }
  func.func @transform_3(%arg0: i32, %arg1: i32) -> (i32, i32) {
    %c0_i32 = arith.constant 0 : i32
    %c0_i32_0 = arith.constant 0 : i32
    %c0_i32_1 = arith.constant 0 : i32
    return %c0_i32, %c0_i32_0 : i32, i32
  }
  func.func @transform_4(%arg0: i32, %arg1: i32) -> (i32, i32) {
    %c0_i32 = arith.constant 0 : i32
    %c0_i32_0 = arith.constant 0 : i32
    %c0_i32_1 = arith.constant 0 : i32
    return %c0_i32, %c0_i32_0 : i32, i32
  }
  func.func @transform_5(%arg0: i32, %arg1: i32) -> (i32, i32, i32) {
    %c0_i32 = arith.constant 0 : i32
    %c0_i32_0 = arith.constant 0 : i32
    return %arg0, %c0_i32, %arg1 : i32, i32, i32
  }
}

</mosaic_0001>

<bundles_post_ra>
// kernel: tpu_custom_call.1
= control target key start
LH: loop header
LB: loop body
LE: loop exit
PB: predicated region body
PF: predicated region fallthrough
CT: control target
= control target key end

     0   :  { %s894_s18 = smov 0   ;;  %s896_s19 = smov 0   ;;  %s1281_s0 = inlined_call_operand.vmem [shape: f32[2,65,128], index: 0, kind: input, shape index: {}, may-alias: {0,5}]   ;;  %s1282_s1 = inlined_call_operand.vmem [shape: f32[3,3,128], index: 1, kind: input, shape index: {}]   ;;  %s1283_s2 = inlined_call_operand.vmem [shape: f32[1,128], index: 2, kind: input, shape index: {}]   ;;  %s1284_s3 = inlined_call_operand.vmem [shape: f32[65,1], index: 3, kind: input, shape index: {}]   ;;  %s1285_s4 = inlined_call_operand.vmem [shape: f32[65,1], index: 4, kind: input, shape index: {}]   ;;  %s1286_s5 = inlined_call_operand.vmem [shape: f32[2,65,128], index: 5, kind: output, shape index: {}, may-alias: {0,5}]  }
   0x1   :  { %s898_s20 = smov 0  }
   0x2 LB: > { %s27_s21 = sadd.s32 1, %s856_s19  ;;  %p788_p0 = scmp.ge.s32.totalorder %s860_s20, 1  ;;  %s860_s20 = sphi %s898_s20, %s15_s20   ;;  %s856_s19 = sphi %s896_s19, %s1302_s19   ;;  %s852_s18 = sphi %s894_s18, %s1301_s18  }
   0x3   : > { %p29_p1 = scmp.ge.s32.totalorder %s27_s21, 2  ;;  %p223_p2 = scmp.lt.s32.totalorder %s860_s20, 3 }
   0x5   : > { %s1304_s21 = smov (%p29_p1, %s27_s21), 0  ;;  %p224_p3 = pnand %p788_p0, %p223_p2 }
   0x7   : > { %227 = sbr.rel (%p224_p3) target bundleno = 178 (0xb2), region = 40 }
   0xc   : > { %v314_v0 = vld [vmem:[%s1284_s3 + $0x20] sm:$0xff]  ;;  %v312_v1 = vld [vmem:[%s1284_s3 + $0x10] sm:$0xff]  ;;  %v862_v3 = vmov 0   ;;  %v315_v4 = vld [vmem:[%s1284_s3 + $0x28] sm:$0xff]  ;;  %p264_p4 = scmp.lt.s32.totalorder %s852_s18, 1  ;;  %v863_v26 = vmov 0.0  }
   0xd   : > { %v310_v2 = vld [vmem:[%s1284_s3] sm:$0xff]  ;;  %828 = vset.pattern.permute.xlu2 %v862_v3  ;;  %827 = vset.pattern.permute.xlu1 %v862_v3  ;;  %v313_v5 = vld [vmem:[%s1284_s3 + $0x18] sm:$0xff]  ;;  %v311_v6 = vld [vmem:[%s1284_s3 + $0x8] sm:$0xff]  ;;  %298 = vst [vmem:[#allocation2 + $0x50] sm:$0xff] %v863_v26 }
   0xe   : > { %826 = vset.pattern.permute.xlu0 %v862_v3  ;;  %480 = vperm.xlu2 %828, %v314_v0   ;;  %v318_v7 = vld [vmem:[%s1284_s3 + $0x40] sm:$0x1]  ;;  %v317_v8 = vld [vmem:[%s1284_s3 + $0x38] sm:$0xff]  ;;  %v316_v9 = vld [vmem:[%s1284_s3 + $0x30] sm:$0xff]  ;;  %s1306_s18 = smov (!%p264_p4, %s852_s18), 1  ;;  %299 = vst [vmem:[#allocation2 + $0x58] sm:$0xff] %v863_v26 }
   0xf   : > { %470 = vperm.xlu1 %827, %v312_v1   ;;  %460 = vperm.xlu0 %826, %v310_v2   ;;  %v321_v10 = vld [vmem:[%s1285_s4 + $0x10] sm:$0xff]  ;;  %v320_v11 = vld [vmem:[%s1285_s4 + $0x8] sm:$0xff]  ;;  %v319_v12 = vld [vmem:[%s1285_s4] sm:$0xff]  ;;  %s799_s12 = smul.u32 72, %s1306_s18  ;;  %296 = vst [vmem:[#allocation2] sm:$0xff] %v863_v26 }
  0x10   : > { %v324_v13 = vld [vmem:[%s1285_s4 + $0x28] sm:$0xff]  ;;  %v323_v14 = vld [vmem:[%s1285_s4 + $0x20] sm:$0xff]  ;;  %v322_v15 = vld [vmem:[%s1285_s4 + $0x18] sm:$0xff]  ;;  %297 = vst [vmem:[#allocation2 + $0x8] sm:$0xff] %v863_v26 }
  0x11   : > { %v327_v16 = vld [vmem:[%s1285_s4 + $0x40] sm:$0x1]  ;;  %v326_v17 = vld [vmem:[%s1285_s4 + $0x38] sm:$0xff]  ;;  %v325_v18 = vld [vmem:[%s1285_s4 + $0x30] sm:$0xff]  ;;  %s271_s15 = scalar_lea.vmem %s1281_s0, %s799_s12  ;;  %s1153_s22 = scalar_lea.vmem %s1286_s5, %s799_s12 }
  0x12   : > { %v978_v19 = vld [vmem:[%s271_s15 + $0x10] sm:$0xff]  ;;  %v980_v20 = vld [vmem:[%s271_s15 + $0x18] sm:$0xff]  ;;  %v982_v21 = vld [vmem:[%s271_s15 + $0x20] sm:$0xff] }
  0x13   : > { %v984_v22 = vld [vmem:[%s271_s15 + $0x28] sm:$0xff]  ;;  %302 = vst [vmem:[#allocation2 + $0x20] sm:$0xff] %v978_v19  ;;  %v990_v23 = vld [vmem:[%s271_s15 + $0x30] sm:$0xff]  ;;  %v993_v24 = vld [vmem:[%s271_s15] sm:$0xff] }
  0x14   : > { %1293 = vst [vmem:[#allocation3_spill] sm:$0xff] %v984_v22  ;;  %v995_v25 = vld [vmem:[%s271_s15 + $0x38] sm:$0xff]  ;;  %v999_v27 = vld [vmem:[%s271_s15 + $0x8] sm:$0xff]  ;;  %v1001_v28 = vld [vmem:[%s271_s15 + $0x40] sm:$0x1] }
  0x15   : > { %303 = vst [vmem:[#allocation2 + $0x28] sm:$0xff] %v980_v20  ;;  %v791_v30 = vld [vmem:[%s1282_s1 + $0x5] sm:$0x1]  ;;  %v1015_v33 = vld [vmem:[%s1282_s1] ss:$0 sm:$0xff] }
  0x16   : > { %485 = vperm.xlu2 %828, %v315_v4   ;;  %304 = vst [vmem:[#allocation2 + $0x30] sm:$0xff] %v982_v21  ;;  %v330_v31 = vadd.f32 1.0, %v791_v30  ;;  %v1020_v34 = vld [vmem:[%s1282_s1 + $0x4] ss:$0 sm:$0xff]  ;;  %v1025_v35 = vld [vmem:[%s1282_s1 + $0x1] ss:$0 sm:$0xff] }
  0x17   : > { %475 = vperm.xlu1 %827, %v313_v5   ;;  %465 = vperm.xlu0 %826, %v311_v6   ;;  %305 = vst [vmem:[#allocation2 + $0x38] sm:$0xff] %v984_v22  ;;  %v1036_v39 = vld [vmem:[%s1282_s1 + $0x2] ss:$0 sm:$0xff]  ;;  %v1041_v40 = vld [vmem:[%s1282_s1 + $0x6] ss:$0 sm:$0xff]  ;;  %v354_v54 = vmul.f32 %v1025_v35, %v999_v27  ;;  %v357_v1 = vmul.f32 %v1025_v35, %v982_v21 }
  0x18   : > { %1294 = vst [vmem:[#allocation4_spill] sm:$0xff] %v990_v23  ;;  %v1031_v38 = vperm.slane %v330_v31, 0  ;;  %v1050_v43 = vld [vmem:[%s1282_s1 + $0x8] ss:$0 sm:$0xff]  ;;  %v1063_v48 = vld [vmem:[%s1282_s1 + $0x9] ss:$0 sm:$0xff] }
  0x19   : > { %306 = vst [vmem:[#allocation2 + $0x40] sm:$0xff] %v990_v23  ;;  %v1070_v50 = vld [vmem:[%s1282_s1 + $0xa] ss:$0 sm:$0xff]  ;;  %v437_v30 = vld [vmem:[#allocation2 + $0x57] sm:$0x1] }
  0x1a   : > { %1295 = vst [vmem:[#allocation5_spill] sm:$0xff] %v993_v24  ;;  %v334_v53 = vmul.f32 %v1031_v38, %v978_v19  ;;  %v337_v0 = vmul.f32 %v1031_v38, %v984_v22 }
  0x1b   : > { %300 = vst [vmem:[#allocation2 + $0x10] sm:$0xff] %v993_v24 }
  0x1c   : > { %307 = vst [vmem:[#allocation2 + $0x48] sm:$0xff] %v995_v25  ;;  %v1045_v42 = vld [vmem:[#allocation2 + $0x21] sm:$0xff]  ;;  %v363_v6 = vadd.f32 %v354_v54, %v334_v53  ;;  %v372_v53 = vld [vmem:[#allocation2 + $0x58] sm:$0x1] }
  0x1d   : > { %308 = vst [vmem:[#allocation2 + $0x50] sm:$0x1] %v1001_v28  ;;  %v1052_v44 = vld [vmem:[#allocation2 + $0x2f] sm:$0xff]  ;;  %v547_v52 = vmul.f32 %v1041_v40, %v1045_v42  ;;  %v1080_v55 = vld [vmem:[#allocation2 + $0x27] sm:$0xff] }
  0x1e   : > { %500 = vperm.xlu2 %828, %v318_v7   ;;  %301 = vst [vmem:[#allocation2 + $0x18] sm:$0xff] %v999_v27  ;;  %v1054_v45 = vld [vmem:[#allocation2 + $0x37] sm:$0xff]  ;;  %v410_v56 = vmul.f32 %v1015_v33, %v1052_v44  ;;  %v1086_v58 = vld [vmem:[#allocation2 + $0x29] sm:$0xff]  ;;  %v442_v61 = vmul.f32 %v1050_v43, %v1080_v55  ;;  %v378_v7 = vmul.f32 %v1063_v48, %v980_v20 }
  0x1f   : > { %495 = vperm.xlu1 %827, %v317_v8   ;;  %490 = vperm.xlu0 %826, %v316_v9   ;;  %309 = vst [vmem:[#allocation2 + $0x10] sm:$0x1] %v863_v26  ;;  %v423_v57 = vmul.f32 %v1020_v34, %v1054_v45  ;;  %v1092_v62 = vld [vmem:[#allocation2 + $0x31] sm:$0xff]  ;;  %v569_v5 = vmul.f32 %v1070_v50, %v1086_v58 }
  0x20   : > { %v1088_v59 = vld [vmem:[#allocation2 + $0x3f] sm:$0xff]  ;;  %v402_v2 = vld [vmem:[#allocation2 + $0x47] sm:$0x1]  ;;  %v381_v26 = vmul.f32 %v1063_v48, %v990_v23 }
  0x21   : > { %v1094_v63 = vld [vmem:[#allocation2 + $0x39] sm:$0xff]  ;;  %v432_v8 = vadd.f32 %v423_v57, %v410_v56  ;;  %v445_v9 = vmul.f32 %v1050_v43, %v1088_v59 }
  0x23   : > { %v415_v3 = vld [vmem:[#allocation2 + $0x4f] sm:$0x1] }
  0x25   : > { %v1027_v36 = vld [vmem:[#allocation2 + $0x17] sm:$0xff]  ;;  %v1029_v37 = vld [vmem:[#allocation2 + $0x1f] sm:$0xff] }
  0x26   : > { %597 = vperm.xlu2 %828, %v321_v10   ;;  %v1043_v41 = vld [vmem:[#allocation2 + $0x19] sm:$0xff]  ;;  %v407_v46 = vmul.f32 %v1015_v33, %v1027_v36  ;;  %v420_v47 = vmul.f32 %v1020_v34, %v1029_v37  ;;  %v537_v10 = vmul.f32 %v1036_v39, %v1092_v62 }
  0x27   : > { %592 = vperm.xlu1 %827, %v320_v11   ;;  %587 = vperm.xlu0 %826, %v319_v12   ;;  %v534_v51 = vmul.f32 %v1036_v39, %v1043_v41  ;;  %v550_v11 = vmul.f32 %v1041_v40, %v1094_v63 }
  0x28   : > { %v429_v60 = vadd.f32 %v420_v47, %v407_v46  ;;  %v387_v47 = vadd.f32 %v378_v7, %v363_v6  ;;  %v422_v6 = vmul.f32 %v1020_v34, %v1052_v44 }
  0x29   : > { %v556_v4 = vadd.f32 %v547_v52, %v534_v51  ;;  %v356_v51 = vmul.f32 %v1025_v35, %v980_v20  ;;  %v454_v52 = vadd.f32 %v445_v9, %v432_v8  ;;  %v559_v57 = vadd.f32 %v550_v11, %v537_v10 }
  0x2a   : > { %v451_v12 = vadd.f32 %v442_v61, %v429_v60  ;;  %v1126_v61 = vmul.f32 %v1063_v48, %v984_v22  ;;  %v448_v8 = vmul.f32 %v1050_v43, %v437_v30  ;;  %v384_v10 = vmul.f32 %v1063_v48, %v372_v53 }
  0x2b   : > { %v578_v46 = vadd.f32 %v569_v5, %v556_v4  ;;  %v542_v4 = vld [vmem:[#allocation2 + $0x51] sm:$0x1]  ;;  %v409_v5 = vmul.f32 %v1015_v33, %v1080_v55  ;;  %v332_v30 = vmul.f32 %v1031_v38, %v993_v24  ;;  %v376_v24 = vmul.f32 %v1063_v48, %v999_v27 }
  0x2e   : > { %612 = vperm.xlu2 %828, %v324_v13   ;;  %v1110_v13 = vld [vmem:[#allocation2 + $0x41] sm:$0xff] }
  0x2f   : > { %607 = vperm.xlu1 %827, %v323_v14   ;;  %602 = vperm.xlu0 %826, %v322_v15   ;;  %1296 = vst [vmem:[#allocation6_spill] sm:$0xff] %v1110_v13  ;;  %v336_v14 = vmul.f32 %v1031_v38, %v982_v21  ;;  %v349_v15 = vld [vmem:[#allocation2 + $0x48] sm:$0x1]  ;;  %v572_v60 = vmul.f32 %v1070_v50, %v1110_v13  ;;  %v395_v13 = vld [vmem:[#allocation2 + $0xf] sm:$0xff] }
  0x31   : > { %v581_v22 = vadd.f32 %v572_v60, %v559_v57  ;;  %v418_v60 = vmul.f32 %v1020_v34, %v395_v13 }
  0x36   : > { %627 = vperm.xlu2 %828, %v327_v16   ;;  %v413_v16 = vmul.f32 %v1015_v33, %v402_v2 }
  0x37   : > { %622 = vperm.xlu1 %827, %v326_v17   ;;  %617 = vperm.xlu0 %826, %v325_v18   ;;  %v426_v17 = vmul.f32 %v1020_v34, %v415_v3  ;;  %v366_v18 = vadd.f32 %v357_v1, %v337_v0  ;;  %v340_v0 = vmul.f32 %v1031_v38, %v1001_v28  ;;  %v529_v3 = vld [vmem:[#allocation2 + $0x49] sm:$0x1]  ;;  %v1140_v28 = vld [vmem:[%s1283_s2] ss:$0 sm:$0xff] }
  0x38   : > { %v360_v1 = vmul.f32 %v1025_v35, %v349_v15  ;;  %v394_v15 = vld [vmem:[#allocation2 + $0x7] sm:$0xff] }
  0x39   : > { %v435_v7 = vadd.f32 %v426_v17, %v413_v16  ;;  %v390_v9 = vadd.f32 %v381_v26, %v366_v18  ;;  %v540_v16 = vmul.f32 %v1036_v39, %v529_v3  ;;  %v553_v17 = vmul.f32 %v1041_v40, %v542_v4 }
  0x3a   : > { %v369_v18 = vadd.f32 %v360_v1, %v340_v0  ;;  %v405_v53 = vmul.f32 %v1015_v33, %v394_v15  ;;  %v406_v1 = vmul.f32 %v1015_v33, %v395_v13  ;;  %v440_v13 = vmul.f32 %v1050_v43, %v1027_v36 }
  0x3c   : > { %v393_v15 = vadd.f32 %v384_v10, %v369_v18 }
  0x68   : > { %v1005_v29 = vpop.permute.xlu2 %480 }
  0x70   : > { %v1010_v32 = vpop.permute.xlu2 %485 }
  0x78   : > { %v1065_v49 = vpop.permute.xlu2 %500 }
  0x80   : > { %v598_v31 = vpop.permute.xlu2 %597 }
  0x81   : > { %v471_v54 = vpop.permute.xlu1 %470  ;;  %v1120_v56 = vpop.permute.xlu0 %460  ;;  %v632_v11 = vmul.f32 %v598_v31, %v578_v46  ;;  %v352_v31 = vmul.f32 0.0, %v1025_v35  ;;  %v564_v46 = vld [vmem:[#allocation2 + $0x59] sm:$0x1] }
  0x82   : > { %v505_v2 = vmul.f32 %v471_v54, %v451_v12  ;;  %v508_v54 = vmul.f32 %v1010_v32, %v454_v52  ;;  %v365_v32 = vadd.f32 %v356_v51, %v336_v14  ;;  %v457_v52 = vadd.f32 %v448_v8, %v435_v7 }
  0x83   : > { %v562_v7 = vadd.f32 %v553_v17, %v540_v16  ;;  %v575_v8 = vmul.f32 %v1070_v50, %v564_v46  ;;  %v521_v16 = vld [vmem:[#allocation2 + $0x9] sm:$0xff]  ;;  %v441_v17 = vmul.f32 %v1050_v43, %v1029_v37  ;;  %v546_v46 = vmul.f32 %v1041_v40, %v1043_v41 }
  0x84   : > { %v514_v12 = vadd.f32 %v505_v2, %v387_v47  ;;  %v444_v47 = vmul.f32 %v1050_v43, %v1054_v45  ;;  %v419_v2 = vmul.f32 %v1020_v34, %v1027_v36  ;;  %v517_v3 = vadd.f32 %v508_v54, %v390_v9  ;;  %v522_v54 = vld [vmem:[#allocation2 + $0x11] sm:$0xff] }
  0x85   : > { %v421_v9 = vmul.f32 %v1020_v34, %v1080_v55  ;;  %v511_v36 = vmul.f32 %v1065_v49, %v457_v52  ;;  %v533_v55 = vmul.f32 %v1036_v39, %v522_v54 }
  0x86   : > { %v641_v26 = vadd.f32 %v632_v11, %v514_v12  ;;  %v342_v11 = vld [vmem:[#allocation2 + $0x10] sm:$0xff]  ;;  %v431_v12 = vadd.f32 %v422_v6, %v409_v5  ;;  %v427_v5 = vadd.f32 %v418_v60, %v405_v53  ;;  %v333_v6 = vmul.f32 %v1031_v38, %v999_v27 }
  0x87   : > { %v353_v10 = vmul.f32 %v1025_v35, %v342_v11  ;;  %v532_v53 = vmul.f32 %v1036_v39, %v521_v16  ;;  %v545_v27 = vmul.f32 %v1041_v40, %v522_v54  ;;  %v536_v54 = vmul.f32 %v1036_v39, %v1086_v58 }
  0x88   : > { %v654_v57 = vadd.f32 %v1140_v28, %v641_v26  ;;  %v613_v0 = vpop.permute.xlu2 %612  ;;  %v361_v26 = vadd.f32 %v352_v31, %v332_v30  ;;  %v428_v30 = vadd.f32 %v419_v2, %v406_v1  ;;  %v584_v31 = vadd.f32 %v575_v8, %v562_v7  ;;  %v414_v7 = vld [vmem:[#allocation2 + $0x47] sm:$0xff] }
  0x89   : > { %v635_v4 = vmul.f32 %v613_v0, %v581_v22  ;;  %v1163_v14 = vpop.permute.xlu1 %475  ;;  %v466_v51 = vpop.permute.xlu0 %465  ;;  %v408_v22 = vmul.f32 %v1015_v33, %v1029_v37  ;;  %v453_v60 = vadd.f32 %v444_v47, %v431_v12  ;;  %v335_v37 = vmul.f32 %v1031_v38, %v980_v20 }
  0x8a   : > { %663 = vst [vmem:[%s1153_s22 + $0x10] sm:$0xff] %v654_v57  ;;  %v1188_v57 = vadd.f32 %v1126_v61, %v365_v32  ;;  %v385_v49 = vadd.f32 %v376_v24, %v361_v26  ;;  %v362_v0 = vadd.f32 %v353_v10, %v333_v6  ;;  %v377_v1 = vmul.f32 %v1063_v48, %v978_v19 }
  0x8b   : > { %v644_v23 = vadd.f32 %v635_v4, %v517_v3  ;;  %v430_v52 = vadd.f32 %v421_v9, %v408_v22  ;;  %v520_v3 = vadd.f32 %v511_v36, %v393_v15  ;;  %v449_v4 = vadd.f32 %v440_v13, %v427_v5 }
  0x8c   : > { %v450_v11 = vadd.f32 %v441_v17, %v428_v30  ;;  %v555_v20 = vadd.f32 %v546_v46, %v533_v55  ;;  %v568_v8 = vmul.f32 %v1070_v50, %v1045_v42  ;;  %v554_v24 = vadd.f32 %v545_v27, %v532_v53 }
  0x8d   : > { %v657_v18 = vadd.f32 %v1140_v28, %v644_v23  ;;  %v355_v23 = vmul.f32 %v1025_v35, %v978_v19  ;;  %v567_v12 = vmul.f32 %v1070_v50, %v1043_v41  ;;  %v379_v19 = vmul.f32 %v1063_v48, %v982_v21 }
  0x8e   : > { %v443_v15 = vmul.f32 %v1050_v43, %v1052_v44  ;;  %v386_v22 = vadd.f32 %v377_v1, %v362_v0  ;;  %v412_v9 = vmul.f32 %v1015_v33, %v1088_v59  ;;  %v549_v16 = vmul.f32 %v1041_v40, %v1092_v62  ;;  %v541_v0 = vld [vmem:[#allocation2 + $0x49] sm:$0xff] }
  0x8f   : > { %666 = vst [vmem:[%s1153_s22 + $0x28] sm:$0xff] %v657_v18  ;;  %v364_v26 = vadd.f32 %v355_v23, %v335_v37  ;;  %v425_v5 = vmul.f32 %v1020_v34, %v414_v7  ;;  %v535_v21 = vmul.f32 %v1036_v39, %v1045_v42  ;;  %v548_v44 = vmul.f32 %v1041_v40, %v1086_v58  ;;  %v436_v58 = vld [vmem:[#allocation2 + $0x4f] sm:$0xff] }
  0x90   : > { %v628_v2 = vpop.permute.xlu2 %627  ;;  %v503_v6 = vmul.f32 %v1120_v56, %v449_v4  ;;  %v504_v10 = vmul.f32 %v466_v51, %v450_v11  ;;  %v577_v17 = vadd.f32 %v568_v8, %v555_v20  ;;  %v576_v36 = vadd.f32 %v567_v12, %v554_v24  ;;  %v1297_v51 = vld [vmem:[#allocation4_spill] sm:$0xff] }
  0x91   : > { %v638_v61 = vmul.f32 %v628_v2, %v584_v31  ;;  %v1197_v32 = vpop.permute.xlu1 %495  ;;  %v1199_v47 = vpop.permute.xlu0 %490  ;;  %v507_v18 = vmul.f32 %v1005_v29, %v453_v60  ;;  %v452_v30 = vadd.f32 %v443_v15, %v430_v52  ;;  %v411_v31 = vmul.f32 %v1015_v33, %v1054_v45 }
  0x92   : > { %v424_v55 = vmul.f32 %v1020_v34, %v1088_v59  ;;  %v388_v46 = vadd.f32 %v379_v19, %v364_v26  ;;  %v339_v42 = vmul.f32 %v1031_v38, %v995_v25  ;;  %v558_v53 = vadd.f32 %v549_v16, %v536_v54 }
  0x93   : > { %v647_v13 = vadd.f32 %v638_v61, %v520_v3  ;;  %v571_v56 = vmul.f32 %v1070_v50, %v1094_v63  ;;  %v359_v29 = vmul.f32 %v1025_v35, %v1297_v51  ;;  %v434_v27 = vadd.f32 %v425_v5, %v412_v9  ;;  %v1298_v3 = vld [vmem:[#allocation3_spill] sm:$0xff]  ;;  %v371_v61 = vld [vmem:[#allocation2 + $0x50] sm:$0xff] }
  0x94   : > { %v557_v23 = vadd.f32 %v548_v44, %v535_v21  ;;  %v570_v33 = vmul.f32 %v1070_v50, %v1092_v62  ;;  %v512_v34 = vadd.f32 %v503_v6, %v385_v49  ;;  %v513_v45 = vadd.f32 %v504_v10, %v386_v22  ;;  %v1299_v49 = vld [vmem:[#allocation6_spill] sm:$0xff]  ;;  %v1300_v10 = vld [vmem:[#allocation5_spill] sm:$0xff] }
  0x95   : > { %v660_v41 = vadd.f32 %v1140_v28, %v647_v13  ;;  %v447_v1 = vmul.f32 %v1050_v43, %v436_v58  ;;  %v338_v2 = vmul.f32 %v1031_v38, %v1297_v51  ;;  %v358_v4 = vmul.f32 %v1025_v35, %v1298_v3  ;;  %v563_v13 = vld [vmem:[#allocation2 + $0x51] sm:$0xff] }
  0x96   : > { %v433_v11 = vadd.f32 %v424_v55, %v411_v31  ;;  %v446_v20 = vmul.f32 %v1050_v43, %v414_v7  ;;  %v580_v62 = vadd.f32 %v571_v56, %v558_v53  ;;  %v539_v12 = vmul.f32 %v1036_v39, %v1299_v49 }
  0x97   : > { %669 = vst [vmem:[%s1153_s22 + $0x40] sm:$0x1] %v660_v41  ;;  %v552_v26 = vmul.f32 %v1041_v40, %v541_v0  ;;  %v538_v38 = vmul.f32 %v1036_v39, %v1094_v63  ;;  %v551_v35 = vmul.f32 %v1041_v40, %v1299_v49  ;;  %v506_v19 = vmul.f32 %v1163_v14, %v452_v30 }
  0x98   : > { %v579_v15 = vadd.f32 %v570_v33, %v557_v23  ;;  %v516_v22 = vadd.f32 %v507_v18, %v1188_v57  ;;  %v383_v9 = vmul.f32 %v1063_v48, %v371_v61  ;;  %v368_v54 = vadd.f32 %v359_v29, %v339_v42 }
  0x99   : > { %v593_v60 = vpop.permute.xlu1 %592  ;;  %v588_v37 = vpop.permute.xlu0 %587  ;;  %v456_v16 = vadd.f32 %v447_v1, %v434_v27  ;;  %v367_v41 = vadd.f32 %v358_v4, %v338_v2  ;;  %v382_v39 = vmul.f32 %v1063_v48, %v995_v25  ;;  %v561_v14 = vadd.f32 %v552_v26, %v539_v12 }
  0x9a   : > { %v631_v59 = vmul.f32 %v593_v60, %v577_v17  ;;  %v630_v52 = vmul.f32 %v588_v37, %v576_v36  ;;  %v574_v5 = vmul.f32 %v1070_v50, %v563_v13  ;;  %v560_v21 = vadd.f32 %v551_v35, %v538_v38 }
  0x9b   : > { %v573_v44 = vmul.f32 %v1070_v50, %v541_v0  ;;  %v515_v57 = vadd.f32 %v506_v19, %v388_v46  ;;  %v455_v6 = vadd.f32 %v446_v20, %v433_v11  ;;  %v392_v48 = vadd.f32 %v383_v9, %v368_v54 }
  0x9c   : > { %v640_v8 = vadd.f32 %v631_v59, %v513_v45  ;;  %v639_v24 = vadd.f32 %v630_v52, %v512_v34  ;;  %v391_v30 = vadd.f32 %v382_v39, %v367_v41  ;;  %v583_v31 = vadd.f32 %v574_v5, %v561_v14 }
  0x9d   : > { %v582_v55 = vadd.f32 %v573_v44, %v560_v21  ;;  %v510_v42 = vmul.f32 %v1197_v32, %v456_v16  ;;  %v509_v58 = vmul.f32 %v1199_v47, %v455_v6 }
  0x9e   : > { %v653_v43 = vadd.f32 %v1140_v28, %v640_v8  ;;  %v652_v7 = vadd.f32 %v1140_v28, %v639_v24 }
  0x9f   : > { %v519_v51 = vadd.f32 %v510_v42, %v392_v48  ;;  %v518_v29 = vadd.f32 %v509_v58, %v391_v30 }
  0xa0   : > { %662 = vst [vmem:[%s1153_s22 + $0x8] sm:$0xff] %v653_v43 }
  0xa1   : > { %661 = vst [vmem:[%s1153_s22] sm:$0xff] %v652_v7  ;;  %v608_v40 = vpop.permute.xlu1 %607  ;;  %v603_v63 = vpop.permute.xlu0 %602 }
  0xa2   : > { %670 = vst [vmem:[%s1153_s22] sm:$0x1] %v1300_v10  ;;  %v634_v17 = vmul.f32 %v608_v40, %v580_v62  ;;  %v633_v36 = vmul.f32 %v603_v63, %v579_v15 }
  0xa4   : > { %v643_v18 = vadd.f32 %v634_v17, %v516_v22  ;;  %v642_v25 = vadd.f32 %v633_v36, %v515_v57 }
  0xa6   : > { %v656_v50 = vadd.f32 %v1140_v28, %v643_v18  ;;  %v655_v46 = vadd.f32 %v1140_v28, %v642_v25 }
  0xa8   : > { %665 = vst [vmem:[%s1153_s22 + $0x20] sm:$0xff] %v656_v50 }
  0xa9   : > { %664 = vst [vmem:[%s1153_s22 + $0x18] sm:$0xff] %v655_v46  ;;  %v623_v53 = vpop.permute.xlu1 %622  ;;  %v618_v56 = vpop.permute.xlu0 %617 }
  0xaa   : > { %v637_v27 = vmul.f32 %v623_v53, %v583_v31  ;;  %v636_v60 = vmul.f32 %v618_v56, %v582_v55 }
  0xac   : > { %v646_v37 = vadd.f32 %v637_v27, %v519_v51  ;;  %v645_v23 = vadd.f32 %v636_v60, %v518_v29 }
  0xae   : > { %v659_v32 = vadd.f32 %v1140_v28, %v646_v37  ;;  %v658_v33 = vadd.f32 %v1140_v28, %v645_v23 }
  0xb0   : > { %668 = vst [vmem:[%s1153_s22 + $0x38] sm:$0xff] %v659_v32 }
  0xb1   : > { %667 = vst [vmem:[%s1153_s22 + $0x30] sm:$0xff] %v658_v33 }
  0xb2 PF: > { %s15_s20 = sadd.s32 1, %s860_s20   ;;  %s1301_s18 = smov %s856_s19 }
  0xb3   : > { %p12_p5 = scmp.ge.s32.totalorder %s15_s20, 4   ;;  %s1302_s19 = smov %s1304_s21 }
  0xb5   :  { %14 = sbr.rel (!%p12_p5) target bundleno = 2 (0x2), region = 78 }

</bundles_post_ra>
